<compile_context>
chip_gen: v7x
topology: tpu7x:2x2x1
jax: 0.10.0
libtpu: 0.0.40
codegen_flags: <defaults>
</compile_context>

<pallas_src>
import functools

import jax
import jax.numpy as jnp
from jax.experimental import pallas as pl
from jax.experimental.pallas import tpu as pltpu


def _round_up(x, m):
    return (x + m - 1) // m * m


def qnetwork_kernel(x_ref, w1_ref, b1_ref, w2_ref, b2_ref, o_ref):
    """One batch tile.

    x_ref : (TB, num_inputs)        compute dtype (bf16 or f32)
    w1_ref: (HP, num_inputs)        compute dtype   (HP = hidden padded to 128)
    b1_ref: (HP, 1)                 f32
    w2_ref: (num_actions, HP)       compute dtype
    b2_ref: (num_actions, 1)        f32
    o_ref : (num_actions, TB)       f32   (transposed, lane-dense along TB)
    """
    # Layer 1 as an A @ B^T matmul (Q@K^T pattern): h^T[p, t] = sum_n W1[p,n] x[t,n]
    h = jax.lax.dot_general(
        w1_ref[...], x_ref[...],
        dimension_numbers=(((1,), (1,)), ((), ())),
        preferred_element_type=jnp.float32,
    )                                                    # (HP, TB) f32
    h = jnp.maximum(h + b1_ref[...], 0.0)                # bias + ReLU on f32 acc

    # Layer 2: plain matmul, output stays transposed -> lane-dense store.
    q = jnp.dot(w2_ref[...], h.astype(w2_ref.dtype),
                preferred_element_type=jnp.float32)      # (A, TB) f32
    o_ref[...] = (q + b2_ref[...]).astype(o_ref.dtype)


def prepare_qnetwork_params(w1, b1, w2, b2, compute_dtype=jnp.bfloat16):
    """Do the one-time layout work (pad hidden -> multiple of 128 lanes,
    transpose weights to (out, in), cast to the compute dtype).  These tensors
    are tiny and stay VMEM-resident inside the kernel.

    w1: (num_inputs, hidden), b1: (hidden,), w2: (hidden, num_actions), b2: (num_actions,)
    """
    num_inputs, hidden = w1.shape
    num_actions = w2.shape[1]
    hp = max(128, _round_up(hidden, 128))

    w1_t = jnp.zeros((hp, num_inputs), compute_dtype)
    w1_t = w1_t.at[:hidden, :].set(w1.T.astype(compute_dtype))
    b1_c = jnp.zeros((hp, 1), jnp.float32)
    b1_c = b1_c.at[:hidden, 0].set(b1.astype(jnp.float32))

    w2_t = jnp.zeros((num_actions, hp), compute_dtype)
    w2_t = w2_t.at[:, :hidden].set(w2.T.astype(compute_dtype))
    b2_c = b2.astype(jnp.float32).reshape(num_actions, 1)
    return w1_t, b1_c, w2_t, b2_c


def qnetwork_forward(state, params, *, block_b=1024, interpret=False):
    """state: (B, num_inputs).  params: output of prepare_qnetwork_params.
    Returns q-values of shape (B, num_actions), matching the PyTorch module."""
    w1_t, b1_c, w2_t, b2_c = params
    hp, num_inputs = w1_t.shape
    num_actions = w2_t.shape[0]
    compute_dtype = w1_t.dtype

    B, ni = state.shape
    assert ni == num_inputs, f"state feature dim {ni} != weight dim {num_inputs}"

    # Batch tile: full batch if it is small, else a lane-aligned tile.
    TB = B if B <= block_b else _round_up(block_b, 128)
    Bp = _round_up(B, TB)

    x = state
    if Bp != B:
        x = jnp.pad(state, ((0, Bp - B), (0, 0)))
    x = x.astype(compute_dtype)

    out_t = pl.pallas_call(
        qnetwork_kernel,
        out_shape=jax.ShapeDtypeStruct((num_actions, Bp), jnp.float32),
        grid_spec=pltpu.PrefetchScalarGridSpec(
            num_scalar_prefetch=0,
            grid=(Bp // TB,),
            in_specs=[
                # Streamed batch tile (double-buffered by the Pallas pipeline).
                pl.BlockSpec((TB, num_inputs), lambda i: (i, 0)),
                # Resident (constant block index) weights / biases.
                pl.BlockSpec((hp, num_inputs), lambda i: (0, 0)),
                pl.BlockSpec((hp, 1), lambda i: (0, 0)),
                pl.BlockSpec((num_actions, hp), lambda i: (0, 0)),
                pl.BlockSpec((num_actions, 1), lambda i: (0, 0)),
            ],
            # Transposed output: last dim (batch tile) is lane-dense.
            out_specs=pl.BlockSpec((num_actions, TB), lambda i: (0, i)),
        ),
        compiler_params=pltpu.CompilerParams(
            # Batch axis is embarrassingly parallel -> megacore sharding on v7x.
            dimension_semantics=("parallel",),
        ),
        interpret=interpret,
    )(x, w1_t, b1_c, w2_t, b2_c)

    # Drop batch padding, return in PyTorch layout (B, num_actions).
    return out_t[:, :B].T.astype(state.dtype)


def init_params(key, num_inputs, num_actions, hidden_size=64):
    """Deterministic init mimicking PyTorch nn.Linear default (U(-1/sqrt(fan_in), +)).
    Weights stored transposed vs torch: (in_features, out_features)."""
    k1, k2, k3, k4 = jax.random.split(key, 4)
    bound1 = 1.0 / jnp.sqrt(jnp.float32(num_inputs))
    bound2 = 1.0 / jnp.sqrt(jnp.float32(hidden_size))
    w1 = jax.random.uniform(k1, (num_inputs, hidden_size), jnp.float32, -bound1, bound1)
    b1 = jax.random.uniform(k2, (hidden_size,), jnp.float32, -bound1, bound1)
    w2 = jax.random.uniform(k3, (hidden_size, num_actions), jnp.float32, -bound2, bound2)
    b2 = jax.random.uniform(k4, (num_actions,), jnp.float32, -bound2, bound2)
    return w1, b1, w2, b2


def qnetwork_reference(state, w1, b1, w2, b2, compute_dtype=jnp.float32):
    """Pure-JAX reference mirroring the kernel's dtype path."""
    dot = functools.partial(jnp.dot, preferred_element_type=jnp.float32,
                            precision=jax.lax.Precision.HIGHEST)
    x = state.astype(compute_dtype)
    h = jnp.maximum(dot(x, w1.astype(compute_dtype)) + b1, 0.0)
    return dot(h.astype(compute_dtype), w2.astype(compute_dtype)) + b2


if __name__ == "__main__":
    key = jax.random.PRNGKey(0)
    batch, num_inputs, num_actions, hidden = 8, 16, 4, 64

    kx, kp, kx2 = jax.random.split(key, 3)
    state = jax.random.normal(kx, (batch, num_inputs), jnp.float32)
    w1, b1, w2, b2 = init_params(kp, num_inputs, num_actions, hidden)

    # --- f32 compute path: same semantics as the PyTorch module -------------
    params_f32 = prepare_qnetwork_params(w1, b1, w2, b2, compute_dtype=jnp.float32)
    q_f32 = jax.block_until_ready(qnetwork_forward(state, params_f32))
    ref_f32 = qnetwork_reference(state, w1, b1, w2, b2, jnp.float32)
    assert q_f32.shape == (batch, num_actions)
    assert jnp.allclose(q_f32, ref_f32, atol=1e-4, rtol=1e-4), "f32 mismatch vs reference"

    # --- default bf16 compute path (halves HBM read traffic) ----------------
    params_bf16 = prepare_qnetwork_params(w1, b1, w2, b2, compute_dtype=jnp.bfloat16)
    q_bf16 = jax.block_until_ready(qnetwork_forward(state, params_bf16))
    ref_bf16 = qnetwork_reference(state, w1, b1, w2, b2, jnp.bfloat16)
    assert jnp.allclose(q_bf16, ref_bf16, atol=2e-2, rtol=2e-2), "bf16 mismatch vs reference"

    # --- multi-tile grid path (batch not a multiple of the tile) ------------
    state2 = jax.random.normal(kx2, (200, num_inputs), jnp.float32)
    q2 = jax.block_until_ready(qnetwork_forward(state2, params_f32, block_b=128))
    ref2 = qnetwork_reference(state2, w1, b1, w2, b2, jnp.float32)
    assert q2.shape == (200, num_actions)
    assert jnp.allclose(q2, ref2, atol=1e-4, rtol=1e-4), "tiled-grid mismatch vs reference"

    print("KERNEL_OK")
</pallas_src>

<mosaic_0001>
module attributes {stable_mosaic.version = 11 : i64} {
  func.func @qnetwork_kernel(%arg0: i32, %arg1: memref<8x16xf32, #tpu.memory_space<vmem>>, %arg2: memref<128x16xf32, #tpu.memory_space<vmem>>, %arg3: memref<128x1xf32, #tpu.memory_space<vmem>>, %arg4: memref<4x128xf32, #tpu.memory_space<vmem>>, %arg5: memref<4x1xf32, #tpu.memory_space<vmem>>, %arg6: memref<4x8xf32, #tpu.memory_space<vmem>>) attributes {dimension_semantics = [#tpu.dimension_semantics<parallel>], iteration_bounds = array<i64: 1>, scalar_prefetch = 0 : i64, scratch_operands = 0 : i64, tpu.core_type = #tpu.core_type<tc>, window_params = [{transform_indices = @transform_0, window_bounds = array<i64: 8, 16>}, {pipeline_mode = #tpu.pipeline_mode<synchronous>, transform_indices = @transform_1, window_bounds = array<i64: 128, 16>}, {pipeline_mode = #tpu.pipeline_mode<synchronous>, transform_indices = @transform_2, window_bounds = array<i64: 128, 1>}, {pipeline_mode = #tpu.pipeline_mode<synchronous>, transform_indices = @transform_3, window_bounds = array<i64: 4, 128>}, {pipeline_mode = #tpu.pipeline_mode<synchronous>, transform_indices = @transform_4, window_bounds = array<i64: 4, 1>}, {transform_indices = @transform_5, window_bounds = array<i64: 4, 8>}]} {
    %c0 = arith.constant 0 : index
    %c0_0 = arith.constant 0 : index
    %0 = vector.load %arg2[%c0, %c0_0] : memref<128x16xf32, #tpu.memory_space<vmem>>, vector<128x16xf32>
    %c0_1 = arith.constant 0 : index
    %c0_2 = arith.constant 0 : index
    %1 = vector.load %arg1[%c0_1, %c0_2] : memref<8x16xf32, #tpu.memory_space<vmem>>, vector<8x16xf32>
    %cst = arith.constant dense<0.000000e+00> : vector<128x8xf32>
    %2 = tpu.matmul %0, %1, %cst {dimension_numbers = #tpu.dot_dimension_numbers<[1], [1], [0], [0], [0, 0, 1, 0], [], []>} : vector<128x16xf32>, vector<8x16xf32>, vector<128x8xf32> -> vector<128x8xf32>
    %c0_3 = arith.constant 0 : index
    %c0_4 = arith.constant 0 : index
    %3 = vector.load %arg3[%c0_3, %c0_4] : memref<128x1xf32, #tpu.memory_space<vmem>>, vector<128x1xf32>
    %4 = vector.broadcast %3 : vector<128x1xf32> to vector<128x8xf32>
    %5 = arith.addf %2, %4 : vector<128x8xf32>
    %cst_5 = arith.constant 0.000000e+00 : f32
    %6 = vector.broadcast %cst_5 : f32 to vector<128x8xf32>
    %7 = arith.maximumf %5, %6 : vector<128x8xf32>
    %c0_6 = arith.constant 0 : index
    %c0_7 = arith.constant 0 : index
    %8 = vector.load %arg4[%c0_6, %c0_7] : memref<4x128xf32, #tpu.memory_space<vmem>>, vector<4x128xf32>
    %cst_8 = arith.constant dense<0.000000e+00> : vector<4x8xf32>
    %9 = tpu.matmul %8, %7, %cst_8 {dimension_numbers = #tpu.dot_dimension_numbers<[1], [0], [0], [1], [0, 0, 1, 1], [], []>} : vector<4x128xf32>, vector<128x8xf32>, vector<4x8xf32> -> vector<4x8xf32>
    %c0_9 = arith.constant 0 : index
    %c0_10 = arith.constant 0 : index
    %10 = vector.load %arg5[%c0_9, %c0_10] : memref<4x1xf32, #tpu.memory_space<vmem>>, vector<4x1xf32>
    %11 = vector.broadcast %10 : vector<4x1xf32> to vector<4x8xf32>
    %12 = arith.addf %9, %11 : vector<4x8xf32>
    %c0_11 = arith.constant 0 : index
    %c0_12 = arith.constant 0 : index
    %13 = vector.load %arg6[%c0_11, %c0_12] : memref<4x8xf32, #tpu.memory_space<vmem>>, vector<4x8xf32>
    tpu.vector_store %arg6[%c0_11, %c0_12], %12 {strides = array<i32>} : memref<4x8xf32, #tpu.memory_space<vmem>>, vector<4x8xf32>,
    return
  }
  func.func @transform_0(%arg0: i32) -> (i32, i32) {
    %c0_i32 = arith.constant 0 : i32
    %c0_i32_0 = arith.constant 0 : i32
    return %arg0, %c0_i32 : i32, i32
  }
  func.func @transform_1(%arg0: i32) -> (i32, i32) {
    %c0_i32 = arith.constant 0 : i32
    %c0_i32_0 = arith.constant 0 : i32
    %c0_i32_1 = arith.constant 0 : i32
    return %c0_i32, %c0_i32_0 : i32, i32
  }
  func.func @transform_2(%arg0: i32) -> (i32, i32) {
    %c0_i32 = arith.constant 0 : i32
    %c0_i32_0 = arith.constant 0 : i32
    %c0_i32_1 = arith.constant 0 : i32
    return %c0_i32, %c0_i32_0 : i32, i32
  }
  func.func @transform_3(%arg0: i32) -> (i32, i32) {
    %c0_i32 = arith.constant 0 : i32
    %c0_i32_0 = arith.constant 0 : i32
    %c0_i32_1 = arith.constant 0 : i32
    return %c0_i32, %c0_i32_0 : i32, i32
  }
  func.func @transform_4(%arg0: i32) -> (i32, i32) {
    %c0_i32 = arith.constant 0 : i32
    %c0_i32_0 = arith.constant 0 : i32
    %c0_i32_1 = arith.constant 0 : i32
    return %c0_i32, %c0_i32_0 : i32, i32
  }
  func.func @transform_5(%arg0: i32) -> (i32, i32) {
    %c0_i32 = arith.constant 0 : i32
    %c0_i32_0 = arith.constant 0 : i32
    return %c0_i32, %arg0 : i32, i32
  }
}

</mosaic_0001>

<bundles_post_ra>
// kernel: tpu_custom_call.1
= control target key start
LH: loop header
LB: loop body
LE: loop exit
PB: predicated region body
PF: predicated region fallthrough
CT: control target
= control target key end

     0   :  { %vm134_vm0 = vcmask 130048   ;;  %v607_v3 = vmov 0   ;;  %s785_s0 = inlined_call_operand.vmem [shape: f32[8,16], index: 0, kind: input, shape index: {}]   ;;  %s786_s1 = inlined_call_operand.vmem [shape: f32[128,16], index: 1, kind: input, shape index: {}]   ;;  %s787_s2 = inlined_call_operand.vmem [shape: f32[128,1], index: 2, kind: input, shape index: {}]   ;;  %s788_s3 = inlined_call_operand.vmem [shape: f32[4,128], index: 3, kind: input, shape index: {}]   ;;  %s789_s4 = inlined_call_operand.vmem [shape: f32[4,1], index: 4, kind: input, shape index: {}]   ;;  %s790_s5 = inlined_call_operand.hbm [shape: f32[4,8], index: 5, kind: output, shape index: {}]  }
   0x1   :  { %v37_v0 = vld [vmem:[%s785_s0] sm:$0xff]  ;;  %v22_v2 = vld [vmem:[%s786_s1 + $0x8] sm:$0xff]  ;;  %581 = vset.pattern.permute.xlu0 %v607_v3  ;;  %v23_v4 = vld [vmem:[%s786_s1 + $0x10] sm:$0xff]  ;;  %582 = vset.pattern.permute.xlu1 %v607_v3 }
   0x2   :  { %v21_v1 = vld [vmem:[%s786_s1] sm:$0xff]  ;;  %491 = vmatprep.subr.msk.mxu0 %vm134_vm0, %v37_v0  ;;  %v24_v6 = vld [vmem:[%s786_s1 + $0x18] sm:$0xff]  ;;  %v40_v7 = vld [vmem:[%s787_s2 + $0x10] sm:$0xff] }
   0x3   :  { %493 = vmatprep.mubr.msk.f32.mxu0 %vm134_vm0, %v21_v1  ;;  %492 = vmatpush3.xpose.msk.msra.mxu0 %vm134_vm0, %v37_v0  ;;  %v38_v5 = vld [vmem:[%s787_s2] sm:$0xff]  ;;  %v39_v9 = vld [vmem:[%s787_s2 + $0x8] sm:$0xff]  ;;  %v41_v10 = vld [vmem:[%s787_s2 + $0x18] sm:$0xff] }
   0x4   :  { %56 = vperm.xlu0 %581, %v38_v5   ;;  %v25_v8 = vld [vmem:[%s786_s1 + $0x20] sm:$0xff]  ;;  %66 = vperm.xlu1 %582, %v40_v7   ;;  %v26_v11 = vld [vmem:[%s786_s1 + $0x28] sm:$0xff]  ;;  %v27_v12 = vld [vmem:[%s786_s1 + $0x30] sm:$0xff] }
   0x5   :  { %v42_v13 = vld [vmem:[%s787_s2 + $0x20] sm:$0xff] }
   0x6   :  { %494 = vmatmul.mubr.msk.f32.vlgmr.msra.gmra.mrb[0].mxu0 %vm134_vm0, %v22_v2 }
   0x7   :  { %496 = vmatprep.mubr.msk.f32.mxu0 %vm134_vm0, %v23_v4 }
   0x8   :  { %61 = vperm.xlu0 %581, %v39_v9   ;;  %71 = vperm.xlu1 %582, %v41_v10  }
   0xa   :  { %497 = vmatmul.mubr.msk.f32.gmra.mrb[2].mxu0 %vm134_vm0, %v24_v6 }
   0xb   :  { %499 = vmatprep.mubr.msk.f32.mxu0 %vm134_vm0, %v25_v8 }
   0xc   :  { %10 = vsyncpa [#allocation3], 0  ;;  %v43_v14 = vld [vmem:[%s787_s2 + $0x28] sm:$0xff]  ;;  %v28_v15 = vld [vmem:[%s786_s1 + $0x38] sm:$0xff]  ;;  %76 = vperm.xlu0 %581, %v42_v13   ;;  %v608_v35 = vmov 0.0|0.0   ;;  %vm609_vm1 = vmmov 0  }
   0xd   :  { %v29_v16 = vld [vmem:[%s786_s1 + $0x40] sm:$0xff]  ;;  %v44_v17 = vld [vmem:[%s787_s2 + $0x30] sm:$0xff]  ;;  %81 = vperm.xlu1 %582, %v43_v14   ;;  %v45_v18 = vld [vmem:[%s787_s2 + $0x38] sm:$0xff]  ;;  %552 = vmatprep.subr.bf16.mxu1 %v608_v35  ;;  %v610_v36 = vmov 0.0   ;;  %vm424_vm2 = vcmask 60416  }
   0xe   :  { %500 = vmatmul.mubr.msk.f32.gmra.mrb[4].mxu0 %vm134_vm0, %v26_v11  ;;  %v30_v19 = vld [vmem:[%s786_s1 + $0x48] sm:$0xff]  ;;  %v31_v20 = vld [vmem:[%s786_s1 + $0x50] sm:$0xff]  ;;  %v46_v21 = vld [vmem:[%s787_s2 + $0x40] sm:$0xff]  ;;  %549 = vmatprep.mubr.msk.f32.mxu1 %vm609_vm1, %v610_v36 }
   0xf   :  { %502 = vmatprep.mubr.msk.f32.mxu0 %vm134_vm0, %v27_v12  ;;  %v47_v22 = vld [vmem:[%s787_s2 + $0x48] sm:$0xff]  ;;  %v32_v23 = vld [vmem:[%s786_s1 + $0x58] sm:$0xff]  ;;  %v33_v24 = vld [vmem:[%s786_s1 + $0x60] sm:$0xff] }
  0x10   :  { %86 = vperm.xlu0 %581, %v44_v17   ;;  %v48_v25 = vld [vmem:[%s787_s2 + $0x50] sm:$0xff]  ;;  %v49_v26 = vld [vmem:[%s787_s2 + $0x58] sm:$0xff]  ;;  %v34_v27 = vld [vmem:[%s786_s1 + $0x68] sm:$0xff] }
  0x11   :  { %91 = vperm.xlu1 %582, %v45_v18   ;;  %v35_v28 = vld [vmem:[%s786_s1 + $0x70] sm:$0xff]  ;;  %v50_v29 = vld [vmem:[%s787_s2 + $0x60] sm:$0xff]  ;;  %v51_v30 = vld [vmem:[%s787_s2 + $0x68] sm:$0xff] }
  0x12   :  { %503 = vmatmul.mubr.msk.f32.gmra.mrb[6].mxu0 %vm134_vm0, %v28_v15  ;;  %v36_v31 = vld [vmem:[%s786_s1 + $0x78] sm:$0xff]  ;;  %v52_v32 = vld [vmem:[%s787_s2 + $0x70] sm:$0xff]  ;;  %v348_v34 = vld [vmem:[%s789_s4] sm:$0xf]  ;;  %s611_s4 = smov [#allocation2]  }
  0x13   :  { %505 = vmatprep.mubr.msk.f32.mxu0 %vm134_vm0, %v29_v16  ;;  %v53_v33 = vld [vmem:[%s787_s2 + $0x78] sm:$0xff]  ;;  %s432_s8 = sshll.u32 %s611_s4, 4  ;;  %s433_s8 = int_to_ptr.vmem [resolvable:$true] %s432_s8 }
  0x14   :  { %96 = vperm.xlu0 %581, %v46_v21   ;;  %s583_s9 = scalar_lea.vmem %s433_s8, 64  ;;  %p588_p1 = scmp.lt.s32.totalorder %s433_s8, %s433_s8 }
  0x15   :  { %101 = vperm.xlu1 %582, %v47_v22   ;;  %p584_p0 = scmp.ne.s32.totalorder %s433_s8, %s583_s9  ;;  %p589_p2 = scmp.lt.s32.totalorder %s583_s9, %s583_s9 }
  0x16   :  { %506 = vmatmul.mubr.msk.f32.gmra.mrb[8].mxu0 %vm134_vm0, %v30_v19 }
  0x17   :  { %508 = vmatprep.mubr.msk.f32.mxu0 %vm134_vm0, %v31_v20  ;;  %p590_p3 = por %p589_p2, %p588_p1 }
  0x18   :  { %106 = vperm.xlu0 %581, %v48_v25  }
  0x19   :  { %111 = vperm.xlu1 %582, %v49_v26   ;;  %p591_p4 = pnand %p590_p3, %p584_p0 }
  0x1a   :  { %509 = vmatmul.mubr.msk.f32.gmra.mrb[10].mxu0 %vm134_vm0, %v32_v23 }
  0x1b   :  { %511 = vmatprep.mubr.msk.f32.mxu0 %vm134_vm0, %v33_v24 }
  0x1c   :  { %116 = vperm.xlu0 %581, %v50_v29  }
  0x1d   :  { %121 = vperm.xlu1 %582, %v51_v30  }
  0x1e   :  { %512 = vmatmul.mubr.msk.f32.gmra.mrb[12].mxu0 %vm134_vm0, %v34_v27 }
  0x1f   :  { %514 = vmatprep.mubr.msk.f32.mxu0 %vm134_vm0, %v35_v28 }
  0x20   :  { %126 = vperm.xlu0 %581, %v52_v32  }
  0x21   :  { %131 = vperm.xlu1 %582, %v53_v33  }
  0x22   :  { %515 = vmatmul.mubr.msk.f32.gmra.mrb[14].mxu0 %vm134_vm0, %v36_v31 }
  0x24   :  { %351 = vperm.xlu0 %581, %v348_v34  }
  0x83   :  { %v67_v37 = vpop.permute.xlu1 %66  ;;  %v57_v38 = vpop.permute.xlu0 %56 }
  0x87   :  { %v72_v39 = vpop.permute.xlu1 %71  ;;  %v62_v40 = vpop.permute.xlu0 %61 }
  0x8b   :  { %v77_v42 = vpop.permute.xlu0 %76 }
  0x8c   :  { %v82_v41 = vpop.permute.xlu1 %81 }
  0x8f   :  { %v87_v51 = vpop.permute.xlu0 %86 }
  0x90   :  { %v92_v48 = vpop.permute.xlu1 %91 }
  0x93   :  { %v97_v0 = vpop.permute.xlu0 %96 }
  0x94   :  { %v102_v61 = vpop.permute.xlu1 %101 }
  0x97   :  { %v107_v12 = vpop.permute.xlu0 %106 }
  0x98   :  { %v112_v9 = vpop.permute.xlu1 %111 }
  0x9b   :  { %v117_v25 = vpop.permute.xlu0 %116 }
  0x9c   :  { %v122_v22 = vpop.permute.xlu1 %121 }
  0xa0   :  { %v132_v34 = vpop.permute.xlu1 %131 }
  0xd9   :  { %v495_v43 = vpop.f32.mrb[0].mxu0 }
  0xda   :  { %v258_v44 = vadd.f32 %v495_v43, %v62_v40  ;;  %v252_v45 = vpop.f32.mrb[1].mxu0 }
  0xdb   :  { %v253_v46 = vadd.f32 %v252_v45, %v57_v38  ;;  %v127_v38 = vpop.permute.xlu0 %126 }
  0xdc   :  { %v332_v47 = vmax.f32 %v258_v44, 0.0 }
  0xdd   :  { %v331_v49 = vmax.f32 %v253_v46, 0.0  ;;  %v498_v50 = vpop.f32.mrb[2].mxu0  ;;  %v347_v46 = vld [vmem:[%s788_s3] sm:$0xf] }
  0xde   :  { %v268_v52 = vadd.f32 %v498_v50, %v72_v39  ;;  %v262_v53 = vpop.f32.mrb[3].mxu0 }
  0xdf   :  { %v263_v54 = vadd.f32 %v262_v53, %v67_v37  ;;  %v553_v55 = vpack.c.bf16 %v332_v47, %v331_v49  ;;  %v352_v47 = vpop.permute.xlu0 %351 }
  0xe0   :  { %v334_v56 = vmax.f32 %v268_v52, 0.0 }
  0xe1   :  { %v333_v57 = vmax.f32 %v263_v54, 0.0  ;;  %v501_v58 = vpop.f32.mrb[4].mxu0  ;;  %554 = vmatpush3.bf16.msra.mxu1 %v553_v55 }
  0xe2   :  { %v278_v59 = vadd.f32 %v501_v58, %v82_v41  ;;  %v272_v60 = vpop.f32.mrb[5].mxu0  ;;  %555 = vmatprep.subr.bf16.mxu1 %v608_v35 }
  0xe3   :  { %v556_v62 = vpack.c.bf16 %v334_v56, %v333_v57  ;;  %v273_v63 = vadd.f32 %v272_v60, %v77_v42 }
  0xe4   :  { %v336_v1 = vmax.f32 %v278_v59, 0.0 }
  0xe5   :  { %v335_v2 = vmax.f32 %v273_v63, 0.0  ;;  %v504_v3 = vpop.f32.mrb[6].mxu0  ;;  %557 = vmatpush3.bf16.msra.mxu1 %v556_v62 }
  0xe6   :  { %v288_v4 = vadd.f32 %v504_v3, %v92_v48  ;;  %v282_v5 = vpop.f32.mrb[7].mxu0  ;;  %558 = vmatprep.subr.bf16.mxu1 %v608_v35 }
  0xe7   :  { %v559_v6 = vpack.c.bf16 %v336_v1, %v335_v2  ;;  %v283_v7 = vadd.f32 %v282_v5, %v87_v51 }
  0xe8   :  { %v338_v8 = vmax.f32 %v288_v4, 0.0 }
  0xe9   :  { %v337_v10 = vmax.f32 %v283_v7, 0.0  ;;  %v507_v11 = vpop.f32.mrb[8].mxu0  ;;  %560 = vmatpush3.bf16.msra.mxu1 %v559_v6 }
  0xea   :  { %v298_v13 = vadd.f32 %v507_v11, %v102_v61  ;;  %v292_v14 = vpop.f32.mrb[9].mxu0  ;;  %561 = vmatprep.subr.bf16.mxu1 %v608_v35 }
  0xeb   :  { %v562_v15 = vpack.c.bf16 %v338_v8, %v337_v10  ;;  %v293_v16 = vadd.f32 %v292_v14, %v97_v0 }
  0xec   :  { %v340_v17 = vmax.f32 %v298_v13, 0.0 }
  0xed   :  { %v339_v18 = vmax.f32 %v293_v16, 0.0  ;;  %v510_v19 = vpop.f32.mrb[10].mxu0  ;;  %563 = vmatpush3.bf16.msra.mxu1 %v562_v15 }
  0xee   :  { %v308_v20 = vadd.f32 %v510_v19, %v112_v9  ;;  %v302_v21 = vpop.f32.mrb[11].mxu0  ;;  %564 = vmatprep.subr.bf16.mxu1 %v608_v35 }
  0xef   :  { %v565_v23 = vpack.c.bf16 %v340_v17, %v339_v18  ;;  %v303_v24 = vadd.f32 %v302_v21, %v107_v12 }
  0xf0   :  { %v342_v26 = vmax.f32 %v308_v20, 0.0 }
  0xf1   :  { %v341_v27 = vmax.f32 %v303_v24, 0.0  ;;  %v513_v28 = vpop.f32.mrb[12].mxu0  ;;  %566 = vmatpush3.bf16.msra.mxu1 %v565_v23 }
  0xf2   :  { %v318_v29 = vadd.f32 %v513_v28, %v122_v22  ;;  %v312_v30 = vpop.f32.mrb[13].mxu0  ;;  %567 = vmatprep.subr.bf16.mxu1 %v608_v35 }
  0xf3   :  { %v568_v31 = vpack.c.bf16 %v342_v26, %v341_v27  ;;  %v313_v32 = vadd.f32 %v312_v30, %v117_v25 }
  0xf4   :  { %v344_v33 = vmax.f32 %v318_v29, 0.0 }
  0xf5   :  { %v343_v36 = vmax.f32 %v313_v32, 0.0  ;;  %v516_v37 = vpop.f32.mrb[14].mxu0  ;;  %569 = vmatpush3.bf16.msra.mxu1 %v568_v31 }
  0xf6   :  { %v328_v39 = vadd.f32 %v516_v37, %v132_v34  ;;  %v322_v40 = vpop.f32.mrb[15].mxu0  ;;  %570 = vmatprep.subr.bf16.mxu1 %v608_v35 }
  0xf7   :  { %v571_v41 = vpack.c.bf16 %v344_v33, %v343_v36  ;;  %v323_v42 = vadd.f32 %v322_v40, %v127_v38 }
  0xf8   :  { %v346_v43 = vmax.f32 %v328_v39, 0.0 }
  0xf9   :  { %v345_v44 = vmax.f32 %v323_v42, 0.0  ;;  %572 = vmatpush3.bf16.msra.mxu1 %v571_v41 }
  0xfa   :  { %573 = vmatprep.subr.bf16.mxu1 %v608_v35 }
  0xfb   :  { %v574_v45 = vpack.c.bf16 %v346_v43, %v345_v44 }
  0xfd   :  { %575 = vmatpush3.bf16.msra.mxu1 %v574_v45 }
 0x100   :  { %550 = vmatmul.mubr.f32.vlgmr.msra.gmra.mrb[0].mxu1 %v347_v46 }
 0x1d3   :  { %v420_v48 = vpop.f32.mrb[0].mxu1 }
 0x1d4   :  { %v421_v49 = vadd.f32 %v420_v48, %v352_v47  ;;  %v551_v50 = vpop.f32.mrb[1].mxu1 }
 0x1d6   :  { %425 = vst.msk [vmem:[#allocation2] sm:$0xf] %vm424_vm2, %v421_v49 }
 0x1d7   :  { %594 = shalt.err (!%p591_p4)
}
 0x1d8   :  { %s595_s3 = scalar_lea.hbm %s790_s5, 64 }
 0x1d9   :  { %p596_p5 = scmp.ne.s32.totalorder %s790_s5, %s595_s3  ;;  %p599_p6 = scmp.lt.u32.totalorder %s595_s3, %s790_s5 }
 0x1db   :  { %p601_p7 = pnand %p599_p6, %p596_p5 }
 0x1dd   :  { %604 = shalt.err (!%p601_p7)
}
 0x1de   :  { %435 = dma.vmem_to_hbm [thread:$0]  %s433_s8, 64, %s790_s5, [#allocation3]  }
 0x1df   :  { %605 = dma.done.wait [#allocation3], 64  }
 0x1e0   :  { %606 = vsyncadd [#allocation3], 4294967232 }
 0x1e1   :  { %439 = vsyncpa [#allocation3], 1 }

</bundles_post_ra>
